<compile_context>
chip_gen: v6e
topology: v6e:2x2x1
jax: 0.10.0
libtpu: 0.0.40
codegen_flags: <defaults>
</compile_context>

<pallas_src>
import jax
import jax.numpy as jnp
from jax.experimental import pallas as pl
from jax.experimental.pallas import tpu as pltpu

HALF_DTYPE = jnp.bfloat16  # TPU stand-in for torch.HalfTensor


def fp16_linear_kernel(x_ref, wt_ref, b_ref, o_ref):
    """One (tm, tn) fp32 output tile, accumulating in-place over the K axis.

    x_ref:  (tm, tk)  HALF_DTYPE  activations (already fp32_to_fp16-cast)
    wt_ref: (tk, tn)  HALF_DTYPE  pre-transposed weight tile (W^T)
    b_ref:  (1,  tn)  HALF_DTYPE  bias tile
    o_ref:  (tm, tn)  float32     output tile (resident across K -> acts as
                                  the accumulator; no separate scratch)
    """
    k = pl.program_id(2)

    # Half-precision MXU matmul, fp32 accumulation; weight arrives as W^T so
    # the contraction is lane-dense on both sides (no in-kernel transpose).
    partial = jnp.dot(x_ref[...], wt_ref[...],
                      preferred_element_type=jnp.float32)

    @pl.when(k == 0)
    def _():
        o_ref[...] = partial          # first K step: direct write, no init pass

    @pl.when(k > 0)
    def _():
        o_ref[...] += partial         # later K steps: accumulate in place

    @pl.when(k == pl.num_programs(2) - 1)
    def _():
        # Bias add in fp32 on the accumulated tile, single narrow to half
        # (FP16_Module output boundary), then fp16_to_fp32 widening.
        y = o_ref[...] + b_ref[...].astype(jnp.float32)
        o_ref[...] = y.astype(HALF_DTYPE).astype(jnp.float32)


def _round_up(a, b):
    return -(-a // b) * b


def _vmem_footprint(tm, tn, tk):
    """Double-buffered VMEM bytes for one grid step's tiles."""
    return (2 * (tm * tk + tk * tn) * 2     # half x tile + half W^T tile
            + 2 * (tm * tn) * 4             # fp32 output tile
            + 2 * tn * 2)                   # half bias row


def prepare_fp16_linear(weight, bias, *, tm_max=512, tn=1024, tk=2048,
                        vmem_budget_bytes=40 * 1024 * 1024):
    """One-time FP16_Module parameter prep (the `module.half()` step + layout).

    Casts the Linear parameters to half, pre-transposes the weight to W^T,
    pads to lane-dense tile multiples, and picks N/K tiles under the VMEM
    budget.  Hoisted out of the per-call forward so the full weight is not
    re-read/re-written in HBM on every forward pass.
    """
    weight_half = weight.astype(HALF_DTYPE)
    bias_half = bias.astype(HALF_DTYPE)
    D_out, D_in = weight_half.shape

    tn = min(tn, _round_up(D_out, 128))
    tk = min(tk, _round_up(D_in, 128))
    tm_w = tm_max  # worst-case M tile for the footprint check

    # Shrink tiles until the double-buffered footprint fits the budget
    # (protects v7x's 64 MiB/TC VMEM; defaults land around ~17 MiB).
    while _vmem_footprint(tm_w, tn, tk) > vmem_budget_bytes:
        if tk > 256 and tk >= tn:
            tk = max(256, _round_up(tk // 2, 128))
        elif tn > 256:
            tn = max(256, _round_up(tn // 2, 128))
        elif tm_w > 64:
            tm_w = max(64, _round_up(tm_w // 2, 16))
        else:
            break

    Np = _round_up(D_out, tn)
    Kp = _round_up(D_in, tk)

    wT = weight_half.T                       # [D_in, D_out], done once
    if (Kp, Np) != wT.shape:
        wT = jnp.pad(wT, ((0, Kp - D_in), (0, Np - D_out)))
    b2 = bias_half.reshape(1, D_out)
    if Np != D_out:
        b2 = jnp.pad(b2, ((0, 0), (0, Np - D_out)))

    return dict(wT=wT, b=b2, tn=tn, tk=tk, tm_max=tm_w,
                D_in=D_in, D_out=D_out, vmem_budget=vmem_budget_bytes)


def fp16_module_forward(x_fp32, params, *, tm=None):
    """Mirrors FP16_Module.forward for a Linear sub-module.

    x_fp32: [B, D_in] float32 (caller-side fp32 activations)
    params: output of prepare_fp16_linear (half-cast, pre-transposed weights)
    returns: [B, D_out] float32
    """
    wT_p, b_p = params["wT"], params["b"]
    tn, tk = params["tn"], params["tk"]
    D_in, D_out = params["D_in"], params["D_out"]
    Kp, Np = wT_p.shape
    B = x_fp32.shape[0]

    # --- fp32_to_fp16(inputs), hoisted before the pallas_call (halves the
    # activation HBM traffic; same semantics as casting inside the kernel).
    x_half = x_fp32.astype(HALF_DTYPE)

    # M tile: 16-sublane aligned (bf16 packs 16 rows per vreg).
    tm = params["tm_max"] if tm is None else tm
    tm = min(tm, _round_up(B, 16))
    Bp = _round_up(B, tm)

    # v7x megacore: give the parallel axes >= 2 blocks when the layer is big
    # enough to split (keeps tn a lane-dense 128-multiple, Np stays divisible).
    if Bp // tm == 1 and Np // tn == 1 and tn % 256 == 0:
        tn //= 2

    # Small-B / decode fast path: collapse the K grid axis when the full-K
    # tiles fit the VMEM budget (weight streamed exactly once, no K loop).
    if _vmem_footprint(tm, tn, Kp) <= params["vmem_budget"]:
        tk = Kp

    if Bp != B or Kp != D_in:
        x_p = jnp.pad(x_half, ((0, Bp - B), (0, Kp - D_in)))
    else:
        x_p = x_half

    grid = (Bp // tm, Np // tn, Kp // tk)

    footprint = _vmem_footprint(tm, tn, tk)
    vmem_limit = int(min(max(footprint + (8 << 20), 32 << 20), 56 << 20))

    cost = pl.CostEstimate(
        flops=2 * B * D_in * D_out,
        transcendentals=0,
        bytes_accessed=(x_p.size * 2 + wT_p.size * 2 + b_p.size * 2
                        + Bp * Np * 4),
    )

    out_padded = pl.pallas_call(
        fp16_linear_kernel,
        out_shape=jax.ShapeDtypeStruct((Bp, Np), jnp.float32),
        grid_spec=pltpu.PrefetchScalarGridSpec(
            num_scalar_prefetch=0,
            grid=grid,
            in_specs=[
                pl.BlockSpec((tm, tk), lambda i, j, k: (i, k)),   # x
                pl.BlockSpec((tk, tn), lambda i, j, k: (k, j)),   # W^T
                pl.BlockSpec((1, tn), lambda i, j, k: (0, j)),    # bias
            ],
            out_specs=pl.BlockSpec((tm, tn), lambda i, j, k: (i, j)),
        ),
        compiler_params=pltpu.CompilerParams(
            dimension_semantics=("parallel", "parallel", "arbitrary"),
            vmem_limit_bytes=vmem_limit,
        ),
        cost_estimate=cost,
    )(x_p, wT_p, b_p)

    # --- fp16_to_fp32(output) already applied in the kernel epilogue; just
    # drop the padding.
    return out_padded[:B, :D_out]


if __name__ == "__main__":
    # Small shapes: batch=8 (sequence tokens), hidden=32 -> 32
    B, D_IN, D_OUT = 8, 32, 32

    key = jax.random.PRNGKey(0)
    k_x, k_w, k_b = jax.random.split(key, 3)

    # Caller passes fp32 inputs (FP16_Module.forward casts them down).
    x = jax.random.normal(k_x, (B, D_IN), dtype=jnp.float32)

    # Deterministic parameter init (fp32 master weights, module.half() in prep).
    weight = (jax.random.normal(k_w, (D_OUT, D_IN), dtype=jnp.float32)
              * (1.0 / jnp.sqrt(D_IN)))
    bias = jax.random.normal(k_b, (1, D_OUT), dtype=jnp.float32) * 0.01

    # One-time parameter prep (hoisted out of the forward path).
    params = prepare_fp16_linear(weight, bias)

    out = fp16_module_forward(x, params)
    out = jax.block_until_ready(out)

    # Sanity: output dtype is fp32 (fp16_to_fp32) and value matches a
    # plain-JAX reference of the same half-precision compute.
    w_half = weight.astype(HALF_DTYPE)
    b_half = bias.astype(HALF_DTYPE)
    acc_ref = jnp.dot(x.astype(HALF_DTYPE), w_half.T,
                      preferred_element_type=jnp.float32)
    ref = ((acc_ref + b_half.astype(jnp.float32))
           .astype(HALF_DTYPE).astype(jnp.float32))
    assert out.dtype == jnp.float32
    assert out.shape == (B, D_OUT)
    assert jnp.allclose(out, ref, atol=1e-2, rtol=1e-2)

    print("KERNEL_OK")
</pallas_src>

<mosaic_0001>
module attributes {stable_mosaic.version = 11 : i64} {
  func.func @fp16_linear_kernel(%arg0: i32, %arg1: i32, %arg2: i32, %arg3: memref<16x128xbf16, #tpu.memory_space<vmem>>, %arg4: memref<128x128xbf16, #tpu.memory_space<vmem>>, %arg5: memref<1x128xbf16, #tpu.memory_space<vmem>>, %arg6: memref<16x128xf32, #tpu.memory_space<vmem>>) attributes {dimension_semantics = [#tpu.dimension_semantics<parallel>, #tpu.dimension_semantics<parallel>, #tpu.dimension_semantics<arbitrary>], iteration_bounds = array<i64: 1, 1, 1>, scalar_prefetch = 0 : i64, scratch_operands = 0 : i64, tpu.core_type = #tpu.core_type<tc>, window_params = [{transform_indices = @transform_0, window_bounds = array<i64: 16, 128>}, {transform_indices = @transform_1, window_bounds = array<i64: 128, 128>}, {transform_indices = @transform_2, window_bounds = array<i64: 1, 128>}, {transform_indices = @transform_3, window_bounds = array<i64: 16, 128>}]} {
    %c0 = arith.constant 0 : index
    %c0_0 = arith.constant 0 : index
    %0 = vector.load %arg3[%c0, %c0_0] : memref<16x128xbf16, #tpu.memory_space<vmem>>, vector<16x128xbf16>
    %c0_1 = arith.constant 0 : index
    %c0_2 = arith.constant 0 : index
    %1 = vector.load %arg4[%c0_1, %c0_2] : memref<128x128xbf16, #tpu.memory_space<vmem>>, vector<128x128xbf16>
    %cst = arith.constant dense<0.000000e+00> : vector<16x128xf32>
    %2 = tpu.matmul %0, %1, %cst {dimension_numbers = #tpu.dot_dimension_numbers<[1], [0], [0], [1], [0, 0, 1, 1], [], []>} : vector<16x128xbf16>, vector<128x128xbf16>, vector<16x128xf32> -> vector<16x128xf32>
    %c0_i32 = arith.constant 0 : i32
    %3 = arith.cmpi eq, %arg2, %c0_i32 : i32
    %4 = arith.extui %3 : i1 to i32
    %c0_i32_3 = arith.constant 0 : i32
    %5 = arith.cmpi ne, %4, %c0_i32_3 : i32
    scf.if %5 {
      %c0_8 = arith.constant 0 : index
      %c0_9 = arith.constant 0 : index
      %12 = vector.load %arg6[%c0_8, %c0_9] : memref<16x128xf32, #tpu.memory_space<vmem>>, vector<16x128xf32>
      tpu.vector_store %arg6[%c0_8, %c0_9], %2 {strides = array<i32>} : memref<16x128xf32, #tpu.memory_space<vmem>>, vector<16x128xf32>,
    } else {
    }
    %c0_i32_4 = arith.constant 0 : i32
    %6 = arith.cmpi sgt, %arg2, %c0_i32_4 : i32
    %7 = arith.extui %6 : i1 to i32
    %c0_i32_5 = arith.constant 0 : i32
    %8 = arith.cmpi ne, %7, %c0_i32_5 : i32
    scf.if %8 {
      %c0_8 = arith.constant 0 : index
      %c0_9 = arith.constant 0 : index
      %12 = vector.load %arg6[%c0_8, %c0_9] : memref<16x128xf32, #tpu.memory_space<vmem>>, vector<16x128xf32>
      %13 = arith.addf %12, %2 : vector<16x128xf32>
      %c0_10 = arith.constant 0 : index
      %c0_11 = arith.constant 0 : index
      %14 = vector.load %arg6[%c0_10, %c0_11] : memref<16x128xf32, #tpu.memory_space<vmem>>, vector<16x128xf32>
      tpu.vector_store %arg6[%c0_10, %c0_11], %13 {strides = array<i32>} : memref<16x128xf32, #tpu.memory_space<vmem>>, vector<16x128xf32>,
    } else {
    }
    %c0_i32_6 = arith.constant 0 : i32
    %9 = arith.cmpi eq, %arg2, %c0_i32_6 : i32
    %10 = arith.extui %9 : i1 to i32
    %c0_i32_7 = arith.constant 0 : i32
    %11 = arith.cmpi ne, %10, %c0_i32_7 : i32
    scf.if %11 {
      %c0_8 = arith.constant 0 : index
      %c0_9 = arith.constant 0 : index
      %12 = vector.load %arg6[%c0_8, %c0_9] : memref<16x128xf32, #tpu.memory_space<vmem>>, vector<16x128xf32>
      %c0_10 = arith.constant 0 : index
      %c0_11 = arith.constant 0 : index
      %13 = vector.load %arg5[%c0_10, %c0_11] : memref<1x128xbf16, #tpu.memory_space<vmem>>, vector<1x128xbf16>
      %14 = arith.extf %13 : vector<1x128xbf16> to vector<1x128xf32>
      %15 = vector.broadcast %14 : vector<1x128xf32> to vector<16x128xf32>
      %16 = arith.addf %12, %15 : vector<16x128xf32>
      %17 = arith.truncf %16 : vector<16x128xf32> to vector<16x128xbf16>
      %18 = arith.extf %17 : vector<16x128xbf16> to vector<16x128xf32>
      %c0_12 = arith.constant 0 : index
      %c0_13 = arith.constant 0 : index
      %19 = vector.load %arg6[%c0_12, %c0_13] : memref<16x128xf32, #tpu.memory_space<vmem>>, vector<16x128xf32>
      tpu.vector_store %arg6[%c0_12, %c0_13], %18 {strides = array<i32>} : memref<16x128xf32, #tpu.memory_space<vmem>>, vector<16x128xf32>,
    } else {
    }
    return
  }
  func.func @transform_0(%arg0: i32, %arg1: i32, %arg2: i32) -> (i32, i32) {
    %c0_i32 = arith.constant 0 : i32
    return %arg0, %arg2 : i32, i32
  }
  func.func @transform_1(%arg0: i32, %arg1: i32, %arg2: i32) -> (i32, i32) {
    %c0_i32 = arith.constant 0 : i32
    return %arg2, %arg1 : i32, i32
  }
  func.func @transform_2(%arg0: i32, %arg1: i32, %arg2: i32) -> (i32, i32) {
    %c0_i32 = arith.constant 0 : i32
    %c0_i32_0 = arith.constant 0 : i32
    return %c0_i32, %arg1 : i32, i32
  }
  func.func @transform_3(%arg0: i32, %arg1: i32, %arg2: i32) -> (i32, i32) {
    %c0_i32 = arith.constant 0 : i32
    return %arg0, %arg1 : i32, i32
  }
}

</mosaic_0001>

<bundles_post_ra>
// kernel: tpu_custom_call.1
= control target key start
LH: loop header
LB: loop body
LE: loop exit
PB: predicated region body
PF: predicated region fallthrough
CT: control target
= control target key end

     0   :  { %8 = vsyncpa [#allocation3], 0  ;;  %s372_s0 = inlined_call_operand.hbm [shape: bf16[16,128], index: 0, kind: input, shape index: {}]   ;;  %s373_s1 = inlined_call_operand.hbm [shape: bf16[128,128], index: 1, kind: input, shape index: {}]   ;;  %s374_s2 = inlined_call_operand.vmem [shape: bf16[1,128], index: 2, kind: input, shape index: {}]   ;;  %s375_s3 = inlined_call_operand.hbm [shape: f32[16,128], index: 3, kind: output, shape index: {}]  }
   0x1   :  { %9 = vsyncpa [#allocation6], 0 }
   0x2   :  { %10 = vsyncpa [#allocation4], 0  ;;  %s331_s12 = smov [#allocation2]  }
   0x3   :  { %s16_s13 = sshll.u32 %s331_s12, 4  ;;  %s17_s13 = int_to_ptr.vmem [resolvable:$true] %s16_s13 }
   0x4   :  { %s273_s14 = scalar_lea.vmem %s17_s13, 128  ;;  %p278_p1 = scmp.lt.s32.totalorder %s17_s13, %s17_s13 }
   0x5   :  { %p274_p0 = scmp.ne.s32.totalorder %s17_s13, %s273_s14  ;;  %p279_p2 = scmp.lt.s32.totalorder %s273_s14, %s273_s14 }
   0x7   :  { %p280_p3 = por %p279_p2, %p278_p1 }
   0x9   :  { %p281_p4 = pnand %p280_p3, %p274_p0 }
   0xb   :  { %284 = shalt.err (!%p281_p4)
}
   0xc   :  { %s332_s15 = smov 64   ;;  %s333_s16 = smov 4  }
   0xd   :  { %22 = dma.hbm_to_vmem [thread:$0]  %s372_s0, 128, %s17_s13, [#allocation3], %s332_s15, %s332_s15, %s333_s16  }
   0xe   :  { %s334_s19 = smov [#allocation5]  }
   0xf   :  { %s28_s20 = sshll.u32 %s334_s19, 4  ;;  %s29_s20 = int_to_ptr.vmem [resolvable:$true] %s28_s20 }
  0x10   :  { %s293_s21 = scalar_lea.vmem %s29_s20, 1024  ;;  %p298_p6 = scmp.lt.s32.totalorder %s29_s20, %s29_s20 }
  0x11   :  { %p294_p5 = scmp.ne.s32.totalorder %s29_s20, %s293_s21  ;;  %p299_p7 = scmp.lt.s32.totalorder %s293_s21, %s293_s21 }
  0x13   :  { %p300_p8 = por %p299_p7, %p298_p6 }
  0x15   :  { %p301_p9 = pnand %p300_p8, %p294_p5 }
  0x17   :  { %304 = shalt.err (!%p301_p9)
}
  0x18   :  { %34 = dma.hbm_to_vmem [thread:$0]  %s373_s1, 1024, %s29_s20, [#allocation6], %s332_s15, %s332_s15, %s333_s16  }
  0x19   :  { %325 = dma.done.wait [#allocation3], 128  }
  0x1a   :  { %326 = vsyncadd [#allocation3], 4294967168 }
  0x1b   :  { %327 = dma.done.wait [#allocation6], 1024  }
  0x1c   :  { %328 = vsyncadd [#allocation6], 4294966272  ;;  %v335_v0 = vmov 0.0   ;;  %vm336_vm0 = vmmov 0   ;;  %v256_v1 = vld [vmem:[#allocation5 + $0x38] sm:$0xff]   ;;  %v257_v2 = vld [vmem:[#allocation5 + $0x30] sm:$0xff]   ;;  %v180_v10 = vlaneseq }
  0x1d   :  { %227 = vmatprep.subr.bf16.mxu0 %v335_v0  ;;  %243 = vmatprep.mubr.msk.bf16.mxu0 %vm336_vm0, %v335_v0  ;;  %v258_v3 = vld [vmem:[#allocation5 + $0x28] sm:$0xff]   ;;  %v259_v4 = vld [vmem:[#allocation5 + $0x20] sm:$0xff]   ;;  %v260_v5 = vld [vmem:[#allocation5 + $0x18] sm:$0xff]   ;;  %s337_s24 = smov [#allocation7]  }
  0x1e   :  { %228 = vmatpush3.bf16.msra.mxu0 %v256_v1  ;;  %v261_v6 = vld [vmem:[#allocation5 + $0x10] sm:$0xff]   ;;  %v262_v7 = vld [vmem:[#allocation5 + $0x8] sm:$0xff]   ;;  %v263_v8 = vld [vmem:[#allocation5] sm:$0xff]   ;;  %v181_v11 = vshrl.u32 %v180_v10, 7  ;;  %s196_s25 = sshll.u32 %s337_s24, 4  ;;  %s197_s25 = int_to_ptr.vmem [resolvable:$true] %s196_s25 }
  0x1f   :  { %229 = vmatprep.subr.bf16.mxu0 %v335_v0  ;;  %v264_v9 = vld [vmem:[#allocation2] sm:$0xff]   ;;  %s305_s26 = scalar_lea.vmem %s197_s25, 256  ;;  %p310_p11 = scmp.lt.s32.totalorder %s197_s25, %s197_s25 }
  0x20   :  { %v178_v12 = vld [vmem:[%s374_s2] sm:$0x1]  ;;  %v182_v14 = vsub.s32 0, %v181_v11  ;;  %p306_p10 = scmp.ne.s32.totalorder %s197_s25, %s305_s26  ;;  %p311_p12 = scmp.lt.s32.totalorder %s305_s26, %s305_s26 }
  0x21   :  { %v179_v13 = vunpack.c.l.bf16 %v178_v12 }
  0x22   :  { %230 = vmatpush3.bf16.msra.mxu0 %v257_v2  ;;  %p312_p13 = por %p311_p12, %p310_p11 }
  0x23   :  { %231 = vmatprep.subr.bf16.mxu0 %v335_v0  ;;  %v183_v16 = vrot.slane %v179_v13, %v182_v14 }
  0x24   :  { %p313_p0 = pnand %p312_p13, %p306_p10 }
  0x26   :  { %232 = vmatpush3.bf16.msra.mxu0 %v258_v3 }
  0x27   :  { %233 = vmatprep.subr.bf16.mxu0 %v335_v0 }
  0x2a   :  { %234 = vmatpush3.bf16.msra.mxu0 %v259_v4 }
  0x2b   :  { %235 = vmatprep.subr.bf16.mxu0 %v335_v0 }
  0x2e   :  { %236 = vmatpush3.bf16.msra.mxu0 %v260_v5 }
  0x2f   :  { %237 = vmatprep.subr.bf16.mxu0 %v335_v0 }
  0x32   :  { %238 = vmatpush3.bf16.msra.mxu0 %v261_v6 }
  0x33   :  { %239 = vmatprep.subr.bf16.mxu0 %v335_v0 }
  0x36   :  { %240 = vmatpush3.bf16.msra.mxu0 %v262_v7 }
  0x37   :  { %241 = vmatprep.subr.bf16.mxu0 %v335_v0 }
  0x3a   :  { %242 = vmatpush3.bf16.msra.mxu0 %v263_v8 }
  0x3d   :  { %244 = vmatmul.mubr.bf16.vlgmr.msra.gmra.mxu0 %v264_v9 }
  0xfd   :  { %v150_v15 = vpop.f32.mrf.mxu0 }
  0xfe   :  { %v184_v19 = vadd.f32 %v183_v16, %v150_v15 }
  0xff   :  { %v245_v17 = vpop.f32.mrf.mxu0 }
 0x101   :  { %v153_v18 = vpop.f32.mrf.mxu0 }
 0x102   :  { %v185_v20 = vadd.f32 %v183_v16, %v153_v18 }
 0x103   :  { %v246_v21 = vpop.f32.mrf.mxu0 }
 0x104   :  { %v186_v22 = vpack.c.bf16 %v185_v20, %v184_v19 }
 0x106   :  { %v187_v23 = vunpack.c.l.bf16 %v186_v22  ;;  %v188_v24 = vunpack.c.h.bf16 %v186_v22 }
 0x108   :  { %190 = vst [vmem:[#allocation7 + $0x8] sm:$0xff] %v188_v24  ;;  %189 = vst [vmem:[#allocation7] sm:$0xff] %v187_v23 }
 0x109   :  { %316 = shalt.err (!%p313_p0)
}
 0x10a   :  { %s338_s2 = smov 128   ;;  %s339_s27 = smov 8  }
 0x10b   :  { %202 = dma.vmem_to_hbm [thread:$0]  %s197_s25, 256, %s375_s3, [#allocation4], %s338_s2, %s338_s2, %s339_s27  }
 0x10c   :  { %329 = dma.done.wait [#allocation4], 256  }
 0x10d   :  { %330 = vsyncadd [#allocation4], 4294967040 }
 0x10e   :  { %206 = vsyncpa [#allocation3], 1 }
 0x10f   :  { %207 = vsyncpa [#allocation6], 1 }
 0x110   :  { %208 = vsyncpa [#allocation4], 1 }

</bundles_post_ra>
